<compile_context>
chip_gen: v7x
topology: tpu7x:2x2x1
jax: 0.10.0
libtpu: 0.0.40
codegen_flags: <defaults>
</compile_context>

<pallas_src>
import functools

import jax
import jax.numpy as jnp
from jax import lax
from jax.experimental import pallas as pl
from jax.experimental.pallas import tpu as pltpu
import numpy as np

MAX_NUM = 99999.0


# ---------------------------------------------------------------------------
# Pallas kernel: DRL.greedy_select hot path (batch on the lane axis)
# ---------------------------------------------------------------------------
def _greedy_select_kernel(tv_ref, tc_ref, mask_ref, pair_ref, v_ref, vc_ref, *, L):
    # Transposed, lane-dense layout -- batch is the LAST (lane) axis.
    #   tv_ref   : [L, TB] f32   task_value pre-tiled over couriers (wrapper)
    #   tc_ref   : [L, TB] f32   task_cost with depot-zero column, flat courier-major
    #   mask_ref : [L, TB] i32   pre-combined (courier | task) mask (wrapper)
    #   pair_ref : [1, TB] i32   flat argmax index (courier*(NS+1) + task)
    #   v_ref    : [L, TB] f32
    #   vc_ref   : [L, TB] f32
    tv = tv_ref[...]
    tc = tc_ref[...]
    mk = mask_ref[...] != 0

    # v = task_value (already courier-tiled), zeroed where cost is the sentinel.
    v = jnp.where(tc < 9999.0, tv, 0.0)

    # score: exact divide (bit-identical to the torch reference semantics).
    score = jnp.maximum(v, 0.0) / (jnp.maximum(tc, 0.0) + 1e-6)
    score = jnp.where(mk | (tc > 9999.0), -99999.0, score)

    # Per-column (= per-batch) flat argmax, first occurrence on ties
    # (torch.max semantics): one cross-sublane max + one masked min over L rows.
    row = lax.broadcasted_iota(jnp.int32, score.shape, 0)
    mx = jnp.max(score, axis=0, keepdims=True)
    idx = jnp.min(jnp.where(score == mx, row, jnp.int32(L)), axis=0, keepdims=True)

    pair_ref[...] = idx
    v_ref[...] = v
    vc_ref[...] = v / tc   # exact divide keeps 0/0 -> NaN at the depot column


def _choose_tb(B, L):
    """Batch-lane tile: one block when it fits, else a multiple of 128 lanes."""
    # bytes per batch column (lane) resident in VMEM:
    #   double-buffered inputs  : 2 * 3L * 4
    #   double-buffered outputs : 2 * (2L + 1) * 4
    #   ~8 full-size f32/i32 intermediates (v, score, mask, iota, ...)
    per_col = 4 * (2 * 3 * L + 2 * (2 * L + 1) + 8 * L)
    budget = 20 << 20        # conservative: v7x has 64 MiB VMEM (32 MiB scoped default)
    max_cols = budget // max(per_col, 1)
    if B <= max_cols:
        return B             # single block: block dims == full array dims
    return max(128, (max_cols // 128) * 128)   # lane tile must be a multiple of 128


def compute_mask_workerpad(customers_data):
    """Static across the decode loop -- compute once, outside the kernel."""
    return customers_data.sum(axis=2) == 0.0        # [B, NC] bool


def greedy_select(task_value, task_cost, mask_workerpad, mask_task, mask_worker):
    """Pallas wrapper reproducing DRL.greedy_select.

    task_value     : [B, NS]        float32  (cs_state.task_value)
    task_cost      : [B, NC, NS]    float32  (cs_state.task_cost)
    mask_workerpad : [B, NC]        bool     (precomputed customers row-sum==0)
    mask_task      : [B, NS+1, 1]   bool
    mask_worker    : [B, NC, 1]     bool
    returns: pair_selected [B,1] int32, v, c, vc  (all [B, NC, NS+1] float32)
    """
    B, NC, NS = task_cost.shape
    NS1 = NS + 1
    L = NC * NS1

    # Depot zero column.  tc1 is materialized ONCE and doubles as the returned
    # `c`; the kernel does not re-emit it (removes a full-size output stream).
    tv1 = jnp.concatenate(
        [jnp.zeros((B, 1), jnp.float32), task_value.astype(jnp.float32)], axis=1)   # [B, NS1]
    tc1 = jnp.concatenate(
        [jnp.zeros((B, NC, 1), jnp.float32), task_cost.astype(jnp.float32)], axis=2)  # [B, NC, NS1]

    # ---- hoisted, lane-dense (batch-last) operands -------------------------
    # All per-courier replication / mask combination happens here in XLA (it
    # fuses with the concats); the kernel does zero relayouts.
    tc_t = tc1.reshape(B, L).T                                                # [L, B]
    tv_t = jnp.tile(tv1.T, (NC, 1))                                           # [L, B]
    m_task = mask_task[:, :, 0].T                                             # [NS1, B]
    m_cour = jnp.logical_or(mask_workerpad.reshape(B, NC),
                            mask_worker.reshape(B, NC)).T                     # [NC, B]
    mk_t = jnp.logical_or(jnp.repeat(m_cour, NS1, axis=0),
                          jnp.tile(m_task, (NC, 1))).astype(jnp.int32)        # [L, B]

    TB = _choose_tb(B, L)
    grid = (pl.cdiv(B, TB),)

    kernel = functools.partial(_greedy_select_kernel, L=L)

    pair_t, v_t, vc_t = pl.pallas_call(
        kernel,
        grid=grid,
        in_specs=[
            pl.BlockSpec((L, TB), lambda b: (0, b)),
            pl.BlockSpec((L, TB), lambda b: (0, b)),
            pl.BlockSpec((L, TB), lambda b: (0, b)),
        ],
        out_specs=[
            pl.BlockSpec((1, TB), lambda b: (0, b)),
            pl.BlockSpec((L, TB), lambda b: (0, b)),
            pl.BlockSpec((L, TB), lambda b: (0, b)),
        ],
        out_shape=[
            jax.ShapeDtypeStruct((1, B), jnp.int32),
            jax.ShapeDtypeStruct((L, B), jnp.float32),
            jax.ShapeDtypeStruct((L, B), jnp.float32),
        ],
        compiler_params=pltpu.CompilerParams(
            # "parallel" vs "arbitrary" does not change single-TC codegen.
            # TODO(synk): on v7x, shard across both TensorCores with a 2-step
            #             grid marked pltpu.CORE_PARALLEL (or pl.core_map).
            dimension_semantics=("arbitrary",),
            vmem_limit_bytes=32 * 1024 * 1024),
    )(tv_t, tc_t, mk_t)

    pair = pair_t.reshape(B, 1)
    v = v_t.T.reshape(B, NC, NS1)
    vc = vc_t.T.reshape(B, NC, NS1)
    return pair, v, tc1, vc


# ---------------------------------------------------------------------------
# Plain-JAX reference (for correctness check) and glue from the module
# ---------------------------------------------------------------------------
def greedy_select_ref(task_value, task_cost, customers_data, mask_task, mask_worker):
    B, NC, NS = task_cost.shape
    tv = jnp.concatenate([jnp.zeros((B, 1)), task_value], axis=1)[:, None, :]
    tv = jnp.broadcast_to(tv, (B, NC, NS + 1))
    tc = jnp.concatenate([jnp.zeros((B, NC, 1)), task_cost], axis=2)
    tv = jnp.where(tc < 9999.0, tv, 0.0)
    tvc = jnp.maximum(tv, 0.0) / (jnp.maximum(tc, 0.0) + 1e-6)
    wp = (customers_data.sum(2, keepdims=True) == 0.0)
    mc = jnp.logical_or(wp, mask_worker)
    m = jnp.logical_or(mc, jnp.swapaxes(mask_task, 1, 2))
    m = jnp.logical_or(m, tc > 9999.0)
    score = jnp.where(m, -99999.0, tvc)
    pair = jnp.argmax(score.reshape(B, -1), axis=1).astype(jnp.int32)[:, None]
    return pair, tv, tc, tv / tc


def generate_aml_inputs(depot_data, grids_data, customers_data, couriers_selected,
                        tsps_data, budget, max_n_customers):
    """Gather glue from the module (torch.gather -> take_along_axis)."""
    idx = jnp.broadcast_to(couriers_selected[..., None],
                           (couriers_selected.shape[0], 1, 2 * max_n_customers))
    this_customers = jnp.take_along_axis(customers_data, idx, axis=1)
    this_tsp = jnp.take_along_axis(tsps_data, couriers_selected[..., None], axis=1).squeeze()
    return depot_data, grids_data, this_customers, this_tsp, budget


# TODO(synk): GraphAttentionEncoder / AMU / AML / tsptw_solver / get_courier_mask
#             are not defined in the provided source, so the full autoregressive
#             while-loop of DRL.forward is not reproduced here.


if __name__ == "__main__":
    # small config consistent with the module:
    # n_rows=2, n_cols=2, episode_time=4, task_duration=2 -> n_sensingtasks = 8
    B, NC, MC, NS, D = 2, 4, 4, 8, 32

    key = jax.random.PRNGKey(0)
    k1, k2, k3, k4, k5, k6 = jax.random.split(key, 6)

    task_value = jax.random.uniform(k1, (B, NS), jnp.float32)
    task_cost = jax.random.uniform(k2, (B, NC, NS), jnp.float32) * 10.0
    infeasible = jax.random.bernoulli(k3, 0.3, (B, NC, NS))
    task_cost = jnp.where(infeasible, MAX_NUM, task_cost)

    customers_data = jax.random.uniform(k4, (B, NC, 2 * MC), jnp.float32)
    customers_data = customers_data.at[:, -1, :].set(0.0)   # padded courier

    mask_task = jnp.zeros((B, NS + 1, 1), dtype=bool).at[:, 0, :].set(True)
    mask_worker = jax.random.bernoulli(k5, 0.2, (B, NC, 1))

    # static across the decode loop -> computed once, outside the kernel
    mask_workerpad = compute_mask_workerpad(customers_data)

    # run the Pallas kernel
    pair, v, c, vc = greedy_select(task_value, task_cost, mask_workerpad,
                                   mask_task, mask_worker)
    jax.block_until_ready((pair, v, c, vc))

    # correctness check against plain-JAX reference
    pair_r, v_r, c_r, vc_r = greedy_select_ref(task_value, task_cost, customers_data,
                                               mask_task, mask_worker)
    np.testing.assert_array_equal(np.asarray(pair), np.asarray(pair_r))
    np.testing.assert_allclose(np.asarray(v), np.asarray(v_r), rtol=1e-6, atol=1e-6)
    np.testing.assert_allclose(np.asarray(c), np.asarray(c_r), rtol=1e-6, atol=1e-6)
    np.testing.assert_allclose(np.asarray(vc), np.asarray(vc_r),
                               rtol=1e-5, atol=1e-5, equal_nan=True)

    # exercise the gather glue used by the forward pass
    depot_data = jax.random.uniform(k6, (B, 1, 4), jnp.float32)
    grids_data = jax.random.uniform(k6, (B, NS, 4), jnp.float32)
    tsps_data = jax.random.uniform(k6, (B, NC, 1), jnp.float32)
    budget = jnp.full((B,), 100.0, jnp.float32)
    couriers_selected = pair // (NS + 1)     # courier index from the selected pair
    _ = generate_aml_inputs(depot_data, grids_data, customers_data,
                            couriers_selected, tsps_data, budget, MC)
    jax.block_until_ready(_)

    print("KERNEL_OK")
</pallas_src>

<mosaic_0001>
module attributes {stable_mosaic.version = 11 : i64} {
  func.func @_greedy_select_kernel(%arg0: i32, %arg1: memref<36x2xf32, #tpu.memory_space<vmem>>, %arg2: memref<36x2xf32, #tpu.memory_space<vmem>>, %arg3: memref<36x2xi32, #tpu.memory_space<vmem>>, %arg4: memref<1x2xi32, #tpu.memory_space<vmem>>, %arg5: memref<36x2xf32, #tpu.memory_space<vmem>>, %arg6: memref<36x2xf32, #tpu.memory_space<vmem>>) attributes {dimension_semantics = [#tpu.dimension_semantics<arbitrary>], iteration_bounds = array<i64: 1>, scalar_prefetch = 0 : i64, scratch_operands = 0 : i64, tpu.core_type = #tpu.core_type<tc>, window_params = [{transform_indices = @transform_0, window_bounds = array<i64: 36, 2>}, {transform_indices = @transform_1, window_bounds = array<i64: 36, 2>}, {transform_indices = @transform_2, window_bounds = array<i64: 36, 2>}, {transform_indices = @transform_3, window_bounds = array<i64: 1, 2>}, {transform_indices = @transform_4, window_bounds = array<i64: 36, 2>}, {transform_indices = @transform_5, window_bounds = array<i64: 36, 2>}]} {
    %c0 = arith.constant 0 : index
    %c0_0 = arith.constant 0 : index
    %0 = vector.load %arg1[%c0, %c0_0] : memref<36x2xf32, #tpu.memory_space<vmem>>, vector<36x2xf32>
    %c0_1 = arith.constant 0 : index
    %c0_2 = arith.constant 0 : index
    %1 = vector.load %arg2[%c0_1, %c0_2] : memref<36x2xf32, #tpu.memory_space<vmem>>, vector<36x2xf32>
    %c0_3 = arith.constant 0 : index
    %c0_4 = arith.constant 0 : index
    %2 = vector.load %arg3[%c0_3, %c0_4] : memref<36x2xi32, #tpu.memory_space<vmem>>, vector<36x2xi32>
    %c0_i32 = arith.constant 0 : i32
    %3 = vector.broadcast %c0_i32 : i32 to vector<36x2xi32>
    %4 = arith.cmpi ne, %2, %3 : vector<36x2xi32>
    %cst = arith.constant 9.999000e+03 : f32
    %5 = vector.broadcast %cst : f32 to vector<36x2xf32>
    %6 = arith.cmpf olt, %1, %5 : vector<36x2xf32>
    %cst_5 = arith.constant 0.000000e+00 : f32
    %7 = vector.broadcast %cst_5 : f32 to vector<36x2xf32>
    %8 = arith.select %6, %0, %7 : vector<36x2xi1>, vector<36x2xf32>
    %cst_6 = arith.constant 0.000000e+00 : f32
    %9 = vector.broadcast %cst_6 : f32 to vector<36x2xf32>
    %10 = arith.maximumf %8, %9 : vector<36x2xf32>
    %cst_7 = arith.constant 0.000000e+00 : f32
    %11 = vector.broadcast %cst_7 : f32 to vector<36x2xf32>
    %12 = arith.maximumf %1, %11 : vector<36x2xf32>
    %cst_8 = arith.constant 9.99999997E-7 : f32
    %13 = vector.broadcast %cst_8 : f32 to vector<36x2xf32>
    %14 = arith.addf %12, %13 : vector<36x2xf32>
    %15 = arith.divf %10, %14 : vector<36x2xf32>
    %cst_9 = arith.constant 9.999000e+03 : f32
    %16 = vector.broadcast %cst_9 : f32 to vector<36x2xf32>
    %17 = arith.cmpf ogt, %1, %16 : vector<36x2xf32>
    %18 = arith.ori %4, %17 : vector<36x2xi1>
    %cst_10 = arith.constant -9.999900e+04 : f32
    %19 = vector.broadcast %cst_10 : f32 to vector<36x2xf32>
    %20 = arith.select %18, %19, %15 : vector<36x2xi1>, vector<36x2xf32>
    %21 = tpu.iota {dimensions = array<i32: 0>} : vector<36x2xi32>
    %cst_11 = arith.constant dense<0xFF800000> : vector<2xf32>
    %22 = vector.multi_reduction <maximumf>, %20, %cst_11 [0] : vector<36x2xf32> to vector<2xf32>
    %23 = vector.shape_cast %22 : vector<2xf32> to vector<1x2xf32>
    %24 = vector.broadcast %23 : vector<1x2xf32> to vector<36x2xf32>
    %25 = arith.cmpf oeq, %20, %24 : vector<36x2xf32>
    %c36_i32 = arith.constant 36 : i32
    %26 = vector.broadcast %c36_i32 : i32 to vector<36x2xi32>
    %27 = arith.select %25, %21, %26 : vector<36x2xi1>, vector<36x2xi32>
    %cst_12 = arith.constant dense<2147483647> : vector<2xi32>
    %28 = vector.multi_reduction <minsi>, %27, %cst_12 [0] : vector<36x2xi32> to vector<2xi32>
    %29 = vector.shape_cast %28 : vector<2xi32> to vector<1x2xi32>
    %c0_13 = arith.constant 0 : index
    %c0_14 = arith.constant 0 : index
    %30 = vector.load %arg4[%c0_13, %c0_14] : memref<1x2xi32, #tpu.memory_space<vmem>>, vector<1x2xi32>
    tpu.vector_store %arg4[%c0_13, %c0_14], %29 {strides = array<i32>} : memref<1x2xi32, #tpu.memory_space<vmem>>, vector<1x2xi32>,
    %c0_15 = arith.constant 0 : index
    %c0_16 = arith.constant 0 : index
    %31 = vector.load %arg5[%c0_15, %c0_16] : memref<36x2xf32, #tpu.memory_space<vmem>>, vector<36x2xf32>
    tpu.vector_store %arg5[%c0_15, %c0_16], %8 {strides = array<i32>} : memref<36x2xf32, #tpu.memory_space<vmem>>, vector<36x2xf32>,
    %32 = arith.divf %8, %1 : vector<36x2xf32>
    %c0_17 = arith.constant 0 : index
    %c0_18 = arith.constant 0 : index
    %33 = vector.load %arg6[%c0_17, %c0_18] : memref<36x2xf32, #tpu.memory_space<vmem>>, vector<36x2xf32>
    tpu.vector_store %arg6[%c0_17, %c0_18], %32 {strides = array<i32>} : memref<36x2xf32, #tpu.memory_space<vmem>>, vector<36x2xf32>,
    return
  }
  func.func @transform_0(%arg0: i32) -> (i32, i32) {
    %c0_i32 = arith.constant 0 : i32
    %c0_i32_0 = arith.constant 0 : i32
    return %c0_i32, %arg0 : i32, i32
  }
  func.func @transform_1(%arg0: i32) -> (i32, i32) {
    %c0_i32 = arith.constant 0 : i32
    %c0_i32_0 = arith.constant 0 : i32
    return %c0_i32, %arg0 : i32, i32
  }
  func.func @transform_2(%arg0: i32) -> (i32, i32) {
    %c0_i32 = arith.constant 0 : i32
    %c0_i32_0 = arith.constant 0 : i32
    return %c0_i32, %arg0 : i32, i32
  }
  func.func @transform_3(%arg0: i32) -> (i32, i32) {
    %c0_i32 = arith.constant 0 : i32
    %c0_i32_0 = arith.constant 0 : i32
    return %c0_i32, %arg0 : i32, i32
  }
  func.func @transform_4(%arg0: i32) -> (i32, i32) {
    %c0_i32 = arith.constant 0 : i32
    %c0_i32_0 = arith.constant 0 : i32
    return %c0_i32, %arg0 : i32, i32
  }
  func.func @transform_5(%arg0: i32) -> (i32, i32) {
    %c0_i32 = arith.constant 0 : i32
    %c0_i32_0 = arith.constant 0 : i32
    return %c0_i32, %arg0 : i32, i32
  }
}

</mosaic_0001>

<bundles_post_ra>
// kernel: tpu_custom_call.1
= control target key start
LH: loop header
LB: loop body
LE: loop exit
PB: predicated region body
PF: predicated region fallthrough
CT: control target
= control target key end

     0   :  { %vm94_vm2 = vcmask 15360   ;;  %vm99_vm6 = vcmask 11264   ;;  %s444_s0 = inlined_call_operand.vmem [shape: f32[36,2], index: 0, kind: input, shape index: {}]   ;;  %s445_s1 = inlined_call_operand.vmem [shape: f32[36,2], index: 1, kind: input, shape index: {}]   ;;  %s446_s2 = inlined_call_operand.vmem [shape: s32[36,2], index: 2, kind: input, shape index: {}]   ;;  %s447_s3 = inlined_call_operand.hbm [shape: s32[1,2], index: 3, kind: output, shape index: {0}]   ;;  %s448_s4 = inlined_call_operand.vmem [shape: f32[36,2], index: 4, kind: output, shape index: {1}]   ;;  %s449_s5 = inlined_call_operand.vmem [shape: f32[36,2], index: 5, kind: output, shape index: {2}]  }
   0x1   :  { %v266_v0 = vld [vmem:[%s445_s1] sm:$0xff]  ;;  %v274_v2 = vld [vmem:[%s445_s1 + $0x8] sm:$0xff]  ;;  %v283_v4 = vld [vmem:[%s445_s1 + $0x10] sm:$0xff] }
   0x2   :  { %v18_v1 = vld [vmem:[%s444_s0] sm:$0xff]  ;;  %188 = vrcp.f32 %v266_v0  ;;  %v19_v3 = vld [vmem:[%s444_s0 + $0x8] sm:$0xff]  ;;  %vm38_vm0 = vcmp.lt.f32.partialorder %v266_v0, 9999.0  ;;  %vm39_vm1 = vcmp.lt.f32.partialorder %v274_v2, 9999.0 }
   0x3   :  { %190 = vrcp.f32 %v274_v2  ;;  %v20_v5 = vld [vmem:[%s444_s0 + $0x10] sm:$0xff]  ;;  %v21_v6 = vld [vmem:[%s444_s0 + $0x18] sm:$0xff]  ;;  %v22_v7 = vld [vmem:[%s444_s0 + $0x20] sm:$0xf]  ;;  %vm40_vm3 = vcmp.lt.f32.partialorder %v283_v4, 9999.0 }
   0x4   :  { %192 = vrcp.f32 %v283_v4  ;;  %v301_v8 = vld [vmem:[%s445_s1 + $0x18] sm:$0xff]  ;;  %v306_v9 = vld [vmem:[%s445_s1 + $0x20] sm:$0xf]  ;;  %v53_v10 = vmax.f32 %v266_v0, 0.0  ;;  %v312_v11 = vsel %vm38_vm0, %v18_v1, 0.0  ;;  %v314_v12 = vsel %vm39_vm1, %v19_v3, 0.0 }
   0x5   :  { %vm41_vm4 = vcmp.lt.f32.partialorder %v301_v8, 9999.0  ;;  %vm42_vm5 = vcmp.lt.f32.partialorder %v306_v9, 9999.0  ;;  %v316_v13 = vsel %vm40_vm3, %v20_v5, 0.0  ;;  %145 = vst.msk [vmem:[%s448_s4] sm:$0xff] %vm94_vm2, %v312_v11 }
   0x6   :  { %v318_v14 = vsel %vm41_vm4, %v21_v6, 0.0  ;;  %v320_v15 = vsel %vm42_vm5, %v22_v7, 0.0  ;;  %146 = vst.msk [vmem:[%s448_s4 + $0x8] sm:$0xff] %vm94_vm2, %v314_v12 }
   0x7   :  { %11 = vsyncpa [#allocation3], 0  ;;  %147 = vst.msk [vmem:[%s448_s4 + $0x10] sm:$0xff] %vm94_vm2, %v316_v13  ;;  %v54_v16 = vmax.f32 %v274_v2, 0.0  ;;  %v55_v17 = vmax.f32 %v283_v4, 0.0  ;;  %v56_v18 = vmax.f32 %v301_v8, 0.0  ;;  %194 = vrcp.f32 %v301_v8 }
   0x8   :  { %148 = vst.msk [vmem:[%s448_s4 + $0x18] sm:$0xff] %vm94_vm2, %v318_v14  ;;  %v57_v19 = vmax.f32 %v306_v9, 0.0  ;;  %v58_v20 = vadd.f32 1e-06, %v53_v10  ;;  %196 = vrcp.f32 %v306_v9  ;;  %v28_v30 = vld [vmem:[%s446_s2] sm:$0xff]  ;;  %v29_v32 = vld [vmem:[%s446_s2 + $0x8] sm:$0xff]  ;;  %v88_v7 = vlaneseq }
   0x9   :  { %149 = vst.msk [vmem:[%s448_s4 + $0x20] sm:$0xf] %vm99_vm6, %v320_v15  ;;  %v59_v21 = vadd.f32 1e-06, %v54_v16  ;;  %v60_v22 = vadd.f32 1e-06, %v55_v17 }
   0xa   :  { %v61_v23 = vadd.f32 1e-06, %v56_v18  ;;  %v62_v25 = vadd.f32 1e-06, %v57_v19  ;;  %198 = vrcp.f32 %v58_v20  ;;  %v30_v33 = vld [vmem:[%s446_s2 + $0x10] sm:$0xff]  ;;  %v31_v34 = vld [vmem:[%s446_s2 + $0x18] sm:$0xff] }
   0xb   :  { %200 = vrcp.f32 %v59_v21  ;;  %vm33_vm7 = vcmp.ne.s32.totalorder %v28_v30, 0  ;;  %v48_v35 = vmax.f32 %v312_v11, 0.0  ;;  %vm73_vm8 = vcmp.gt.f32.partialorder %v266_v0, 9999.0  ;;  %v32_v37 = vld [vmem:[%s446_s2 + $0x20] sm:$0xf] }
   0xc   :  { %v189_v24 = vpop.eup %188  ;;  %202 = vrcp.f32 %v60_v22  ;;  %vm34_vm9 = vcmp.ne.s32.totalorder %v29_v32, 0  ;;  %v49_v38 = vmax.f32 %v314_v12, 0.0  ;;  %vm74_vm10 = vcmp.gt.f32.partialorder %v274_v2, 9999.0  ;;  %vm395_vm15 = vmor %vm33_vm7, %vm73_vm8 }
   0xd   :  { %v191_v26 = vpop.eup %190  ;;  %v151_v27 = vmul.f32 %v189_v24, %v312_v11  ;;  %204 = vrcp.f32 %v61_v23  ;;  %vm35_vm11 = vcmp.ne.s32.totalorder %v30_v33, 0  ;;  %v50_v40 = vmax.f32 %v316_v13, 0.0  ;;  %vm79_vm3 = vmor %vm34_vm9, %vm74_vm10 }
   0xe   :  { %v193_v28 = vpop.eup %192  ;;  %v153_v29 = vmul.f32 %v191_v26, %v314_v12  ;;  %206 = vrcp.f32 %v62_v25  ;;  %vm75_vm12 = vcmp.gt.f32.partialorder %v283_v4, 9999.0  ;;  %vm36_vm13 = vcmp.ne.s32.totalorder %v31_v34, 0 }
   0xf   :  { %160 = vst.msk [vmem:[%s449_s5] sm:$0xff] %vm94_vm2, %v151_v27  ;;  %v155_v31 = vmul.f32 %v193_v28, %v316_v13  ;;  %v51_v43 = vmax.f32 %v318_v14, 0.0  ;;  %vm76_vm14 = vcmp.gt.f32.partialorder %v301_v8, 9999.0  ;;  %vm37_vm0 = vcmp.ne.s32.totalorder %v32_v37, 0  ;;  %vm80_vm4 = vmor %vm35_vm11, %vm75_vm12 }
  0x10   :  { %161 = vst.msk [vmem:[%s449_s5 + $0x8] sm:$0xff] %vm94_vm2, %v153_v29  ;;  %v52_v47 = vmax.f32 %v320_v15, 0.0  ;;  %vm77_vm1 = vcmp.gt.f32.partialorder %v306_v9, 9999.0  ;;  %vm81_vm5 = vmor %vm36_vm13, %vm76_vm14  ;;  %v89_v10 = vshrl.u32 %v88_v7, 7 }
  0x11   :  { %162 = vst.msk [vmem:[%s449_s5 + $0x10] sm:$0xff] %vm94_vm2, %v155_v31  ;;  %v195_v36 = vpop.eup %194  ;;  %vm82_vm7 = vmor %vm37_vm0, %vm77_vm1 }
  0x12   :  { %v197_v39 = vpop.eup %196  ;;  %v157_v41 = vmul.f32 %v195_v36, %v318_v14  ;;  %v90_v13 = vadd.s32 8, %v89_v10  ;;  %v91_v14 = vadd.s32 16, %v89_v10  ;;  %v93_v16 = vadd.s32 32, %v89_v10 }
  0x13   :  { %v159_v45 = vmul.f32 %v197_v39, %v320_v15  ;;  %v92_v15 = vadd.s32 24, %v89_v10 }
  0x14   :  { %v199_v42 = vpop.eup %198  ;;  %163 = vst.msk [vmem:[%s449_s5 + $0x18] sm:$0xff] %vm94_vm2, %v157_v41 }
  0x15   :  { %v201_v46 = vpop.eup %200  ;;  %v64_v48 = vmul.f32 %v199_v42, %v48_v35  ;;  %164 = vst.msk [vmem:[%s449_s5 + $0x20] sm:$0xf] %vm99_vm6, %v159_v45  ;;  %s232_s5 = smov [#allocation2]  }
  0x16   :  { %v203_v49 = vpop.eup %202  ;;  %v66_v50 = vmul.f32 %v201_v46, %v49_v38  ;;  %s171_s1 = sshll.u32 %s232_s5, 4  ;;  %s172_s1 = int_to_ptr.vmem [resolvable:$true] %s171_s1 }
  0x17   :  { %v205_v51 = vpop.eup %204  ;;  %v68_v52 = vmul.f32 %v203_v49, %v50_v40  ;;  %v83_v53 = vsel %vm395_vm15, -99999.0, %v64_v48  ;;  %s208_s13 = scalar_lea.vmem %s172_s1, 16  ;;  %s212_s14 = scalar_lea.vmem %s172_s1, 32 }
  0x18   :  { %v207_v54 = vpop.eup %206  ;;  %v70_v55 = vmul.f32 %v205_v51, %v51_v43  ;;  %v84_v57 = vsel %vm79_vm3, -99999.0, %v66_v50  ;;  %v95_v60 = vsel %vm94_vm2, %v83_v53, -inf  ;;  %p209_p0 = scmp.ne.s32.totalorder %s172_s1, %s208_s13  ;;  %p213_p1 = scmp.lt.s32.totalorder %s172_s1, %s172_s1 }
  0x19   :  { %v72_v56 = vmul.f32 %v207_v54, %v52_v47  ;;  %v85_v58 = vsel %vm80_vm4, -99999.0, %v68_v52  ;;  %v96_v0 = vsel %vm94_vm2, %v84_v57, -inf  ;;  %p214_p2 = scmp.lt.s32.totalorder %s212_s14, %s208_s13 }
  0x1a   :  { %v86_v59 = vsel %vm81_vm5, -99999.0, %v70_v55  ;;  %v97_v61 = vsel %vm94_vm2, %v85_v58, -inf }
  0x1b   :  { %v87_v62 = vsel %vm82_vm7, -99999.0, %v72_v56  ;;  %v98_v63 = vsel %vm94_vm2, %v86_v59, -inf  ;;  %p215_p3 = por %p214_p2, %p213_p1 }
  0x1c   :  { %v100_v1 = vsel %vm99_vm6, %v87_v62, -inf  ;;  %v103_v3 = vmax.f32 %v97_v61, %v98_v63 }
  0x1d   :  { %v101_v2 = vmax.f32 %v95_v60, %v100_v1  ;;  %p216_p4 = pnand %p215_p3, %p209_p0 }
  0x1f   :  { %v102_v4 = vmax.f32 %v101_v2, %v96_v0 }
  0x21   :  { %v104_v5 = vmax.f32 %v102_v4, %v103_v3 }
  0x23   :  { %v105_v6 = vrot.slane %v104_v5, 4 }
  0x25   :  { %v106_v8 = vmax.f32 %v104_v5, %v105_v6 }
  0x27   :  { %v107_v9 = vrot.slane %v106_v8, 2 }
  0x29   :  { %v108_v11 = vmax.f32 %v106_v8, %v107_v9 }
  0x2b   :  { %v109_v12 = vrot.slane %v108_v11, 1 }
  0x2d   :  { %v110_v17 = vmax.f32 %v108_v11, %v109_v12 }
  0x2f   :  { %vm111_vm8 = vcmp.eq.f32.partialorder %v83_v53, %v110_v17  ;;  %vm112_vm9 = vcmp.eq.f32.partialorder %v84_v57, %v110_v17  ;;  %vm113_vm10 = vcmp.eq.f32.partialorder %v85_v58, %v110_v17  ;;  %vm114_vm11 = vcmp.eq.f32.partialorder %v86_v59, %v110_v17 }
  0x30   :  { %vm115_vm12 = vcmp.eq.f32.partialorder %v87_v62, %v110_v17  ;;  %v116_v18 = vsel %vm111_vm8, %v89_v10, 36  ;;  %v117_v19 = vsel %vm112_vm9, %v90_v13, 36  ;;  %v118_v20 = vsel %vm113_vm10, %v91_v14, 36 }
  0x31   :  { %v119_v21 = vsel %vm114_vm11, %v92_v15, 36  ;;  %v120_v22 = vsel %vm115_vm12, %v93_v16, 36  ;;  %v121_v23 = vsel %vm94_vm2, %v116_v18, 2147483647  ;;  %v122_v24 = vsel %vm94_vm2, %v117_v19, 2147483647 }
  0x32   :  { %v123_v25 = vsel %vm94_vm2, %v118_v20, 2147483647  ;;  %v124_v26 = vsel %vm94_vm2, %v119_v21, 2147483647  ;;  %v125_v27 = vsel %vm99_vm6, %v120_v22, 2147483647 }
  0x33   :  { %vm126_vm13 = vcmp.lt.s32.totalorder %v121_v23, %v125_v27  ;;  %vm130_vm14 = vcmp.lt.s32.totalorder %v123_v25, %v124_v26  ;;  %vm143_vm2 = vcmask 8192  }
  0x34   :  { %v127_v28 = vsel %vm126_vm13, %v121_v23, %v125_v27  ;;  %v131_v29 = vsel %vm130_vm14, %v123_v25, %v124_v26 }
  0x35   :  { %vm128_vm15 = vcmp.lt.s32.totalorder %v127_v28, %v122_v24 }
  0x36   :  { %v129_v30 = vsel %vm128_vm15, %v127_v28, %v122_v24 }
  0x37   :  { %vm132_vm0 = vcmp.lt.s32.totalorder %v129_v30, %v131_v29 }
  0x38   :  { %v133_v31 = vsel %vm132_vm0, %v129_v30, %v131_v29 }
  0x39   :  { %v134_v32 = vrot.slane %v133_v31, 4 }
  0x3b   :  { %vm135_vm1 = vcmp.lt.s32.totalorder %v133_v31, %v134_v32 }
  0x3c   :  { %v136_v33 = vsel %vm135_vm1, %v133_v31, %v134_v32 }
  0x3d   :  { %v137_v34 = vrot.slane %v136_v33, 2 }
  0x3f   :  { %vm138_vm3 = vcmp.lt.s32.totalorder %v136_v33, %v137_v34 }
  0x40   :  { %v139_v35 = vsel %vm138_vm3, %v136_v33, %v137_v34 }
  0x41   :  { %v140_v36 = vrot.slane %v139_v35, 1 }
  0x43   :  { %vm141_vm4 = vcmp.lt.s32.totalorder %v139_v35, %v140_v36 }
  0x44   :  { %v142_v37 = vsel %vm141_vm4, %v139_v35, %v140_v36 }
  0x45   :  { %144 = vst.msk [vmem:[#allocation2] sm:$0x1] %vm143_vm2, %v142_v37 }
  0x46   :  { %219 = shalt.err (!%p216_p4)
}
  0x47   :  { %s220_s17 = scalar_lea.hbm %s447_s3, 16 }
  0x48   :  { %p221_p5 = scmp.ne.s32.totalorder %s447_s3, %s220_s17  ;;  %p224_p6 = scmp.lt.u32.totalorder %s220_s17, %s447_s3 }
  0x4a   :  { %p226_p7 = pnand %p224_p6, %p221_p5 }
  0x4c   :  { %229 = shalt.err (!%p226_p7)
}
  0x4d   :  { %174 = dma.vmem_to_hbm [thread:$0]  %s172_s1, 16, %s447_s3, [#allocation3]  }
  0x4e   :  { %230 = dma.done.wait [#allocation3], 16  }
  0x4f   :  { %231 = vsyncadd [#allocation3], 4294967280 }
  0x50   :  { %186 = vsyncpa [#allocation3], 1 }

</bundles_post_ra>
